<compile_context>
chip_gen: v5e
topology: v5e:2x2
jax: 0.10.0
libtpu: 0.0.40
codegen_flags: <defaults>
</compile_context>

<pallas_src>
import functools
import numpy as np

import jax
import jax.numpy as jnp
from jax.experimental import pallas as pl
from jax.experimental.pallas import tpu as pltpu


def _round_up(x, m):
    return ((x + m - 1) // m) * m


# ---------------------------------------------------------------------------
# Pallas fused matmul kernels: out = [relu](x @ w * scale + bias [+ residual])
#   grid = (M//tm, N//tn, K//tk), K innermost ("arbitrary"); the f32
#   accumulator scratch is (tm, tn) and the output block index is constant
#   along k, so it stays VMEM-resident across the reduction.
# ---------------------------------------------------------------------------
def _mm_kernel(x_ref, w_ref, s_ref, b_ref, o_ref, acc_ref, *, relu):
    k = pl.program_id(2)

    @pl.when(k == 0)
    def _():
        acc_ref[...] = jnp.zeros_like(acc_ref)

    acc_ref[...] += jnp.dot(x_ref[...], w_ref[...],
                            preferred_element_type=jnp.float32)

    @pl.when(k == pl.num_programs(2) - 1)
    def _():
        y = acc_ref[...] * s_ref[...] + b_ref[...]
        if relu:
            y = jnp.maximum(y, 0.0)
        o_ref[...] = y.astype(o_ref.dtype)


def _mm_res_kernel(x_ref, w_ref, s_ref, b_ref, r_ref, o_ref, acc_ref, *, relu):
    k = pl.program_id(2)

    @pl.when(k == 0)
    def _():
        acc_ref[...] = jnp.zeros_like(acc_ref)

    acc_ref[...] += jnp.dot(x_ref[...], w_ref[...],
                            preferred_element_type=jnp.float32)

    @pl.when(k == pl.num_programs(2) - 1)
    def _():
        y = (acc_ref[...] * s_ref[...] + b_ref[...]
             + r_ref[...].astype(jnp.float32))
        if relu:
            y = jnp.maximum(y, 0.0)
        o_ref[...] = y.astype(o_ref.dtype)


def fused_matmul(x, w, scale, bias, residual=None, relu=False,
                 out_dtype=jnp.bfloat16):
    """x:(M,K) w:(K,N) scale/bias:(N,) residual:(M,N) or None."""
    M, K = x.shape
    N = w.shape[1]

    # bf16 matmul operands (f32 accumulation + f32 epilogue inside the kernel)
    x = x.astype(jnp.bfloat16)
    w = w.astype(jnp.bfloat16)
    if residual is not None:
        residual = residual.astype(jnp.bfloat16)
    scale = scale.astype(jnp.float32)
    bias = bias.astype(jnp.float32)

    # ---- pad N to a lane-dense multiple of 128 (e.g. score2: N=2) ----
    Np = _round_up(N, 128)
    if Np != N:
        w = jnp.pad(w, ((0, 0), (0, Np - N)))
        scale = jnp.pad(scale, (0, Np - N), constant_values=1.0)
        bias = jnp.pad(bias, (0, Np - N))
        if residual is not None:
            residual = jnp.pad(residual, ((0, 0), (0, Np - N)))

    # ---- pad/tile M: tm <= 512 rows, multiple of 8 sublanes ----
    Mp = _round_up(M, 8)
    tm = min(512, Mp)
    Mp = _round_up(Mp, tm)
    if Mp != M:
        x = jnp.pad(x, ((0, Mp - M), (0, 0)))
        if residual is not None:
            residual = jnp.pad(residual, ((0, Mp - M), (0, 0)))

    tn = 256 if Np % 256 == 0 else 128
    tk = 256 if K % 256 == 0 else (128 if K % 128 == 0 else K)
    grid = (Mp // tm, Np // tn, K // tk)

    in_specs = [
        pl.BlockSpec((tm, tk), lambda i, j, k: (i, k)),
        pl.BlockSpec((tk, tn), lambda i, j, k: (k, j)),
        pl.BlockSpec((1, tn), lambda i, j, k: (0, j)),
        pl.BlockSpec((1, tn), lambda i, j, k: (0, j)),
    ]
    args = [x, w, scale.reshape(1, Np), bias.reshape(1, Np)]
    if residual is not None:
        in_specs.append(pl.BlockSpec((tm, tn), lambda i, j, k: (i, j)))
        args.append(residual)
        kernel = functools.partial(_mm_res_kernel, relu=relu)
    else:
        kernel = functools.partial(_mm_kernel, relu=relu)

    out = pl.pallas_call(
        kernel,
        out_shape=jax.ShapeDtypeStruct((Mp, Np), out_dtype),
        grid_spec=pltpu.PrefetchScalarGridSpec(
            num_scalar_prefetch=0,
            grid=grid,
            in_specs=in_specs,
            out_specs=pl.BlockSpec((tm, tn), lambda i, j, k: (i, j)),
            scratch_shapes=[pltpu.VMEM((tm, tn), jnp.float32)],
        ),
        compiler_params=pltpu.CompilerParams(
            dimension_semantics=("parallel", "parallel", "arbitrary"),
            vmem_limit_bytes=32 * 1024 * 1024),
    )(*args)

    if Mp != M or Np != N:
        out = out[:M, :N]
    return out


# ---------------------------------------------------------------------------
# Conv glue (im2col, bf16) around the Pallas kernel
# ---------------------------------------------------------------------------
def _im2col(x, kh, kw):
    """x: (B,H,W,C) -> (B,H,W, kh*kw*C), stride 1, 'same' zero padding."""
    B, H, W, C = x.shape
    ph, pw = kh // 2, kw // 2
    xp = jnp.pad(x, ((0, 0), (ph, ph), (pw, pw), (0, 0)))
    cols = []
    for i in range(kh):
        for j in range(kw):
            cols.append(xp[:, i:i + H, j:j + W, :])
    return jnp.concatenate(cols, axis=-1)


def conv_bn(x, p, residual=None, relu=False, out_dtype=jnp.bfloat16):
    """x: (B,H,W,Cin) NHWC; p['w']: (kh,kw,Cin,Cout); fused BN + opt. residual/ReLU."""
    B, H, W, C = x.shape
    kh, kw = p['kh'], p['kw']
    xb = x.astype(jnp.bfloat16)
    cols = xb if (kh == 1 and kw == 1) else _im2col(xb, kh, kw)
    K = kh * kw * C
    x2d = cols.reshape(B * H * W, K)
    w2d = p['w'].reshape(K, -1)
    Cout = w2d.shape[1]
    r2d = None if residual is None else residual.reshape(B * H * W, Cout)
    out = fused_matmul(x2d, w2d, p['scale'], p['bias'],
                       residual=r2d, relu=relu, out_dtype=out_dtype)
    return out.reshape(B, H, W, Cout)


# ---------------------------------------------------------------------------
# Pooling / resize glue (matches PyTorch semantics)
# ---------------------------------------------------------------------------
def adaptive_avg_pool(x, out_h, out_w):
    """PyTorch AdaptiveAvgPool2d semantics, NHWC input."""
    B, H, W, C = x.shape

    def pool_mat(in_size, out_size):
        i = jnp.arange(out_size)
        starts = (i * in_size) // out_size
        ends = ((i + 1) * in_size + out_size - 1) // out_size
        idx = jnp.arange(in_size)
        m = ((idx[None, :] >= starts[:, None]) &
             (idx[None, :] < ends[:, None])).astype(jnp.float32)
        return m / (ends - starts)[:, None].astype(jnp.float32)

    mh = pool_mat(H, out_h)
    mw = pool_mat(W, out_w)
    x = jnp.einsum('ph,bhwc->bpwc', mh, x.astype(jnp.float32))
    x = jnp.einsum('qw,bpwc->bpqc', mw, x)
    return x


def bilinear_resize(x, out_h, out_w):
    """F.interpolate(mode='bilinear', align_corners=True), NHWC input."""
    B, H, W, C = x.shape

    def coords(in_size, out_size):
        if out_size == 1:
            return jnp.zeros((1,), jnp.float32)
        return jnp.arange(out_size, dtype=jnp.float32) * (
            (in_size - 1) / (out_size - 1))

    ys = coords(H, out_h)
    xs = coords(W, out_w)
    y0f = jnp.floor(ys)
    x0f = jnp.floor(xs)
    y0 = jnp.clip(y0f.astype(jnp.int32), 0, H - 1)
    x0 = jnp.clip(x0f.astype(jnp.int32), 0, W - 1)
    y1 = jnp.clip(y0 + 1, 0, H - 1)
    x1 = jnp.clip(x0 + 1, 0, W - 1)
    wy = (ys - y0f)[None, :, None, None]
    wx = (xs - x0f)[None, None, :, None]

    xf = x.astype(jnp.float32)
    xr = xf[:, y0]            # (B, out_h, W, C)
    tl = xr[:, :, x0]
    tr = xr[:, :, x1]
    xr1 = xf[:, y1]
    bl = xr1[:, :, x0]
    br = xr1[:, :, x1]
    top = tl * (1.0 - wx) + tr * wx
    bot = bl * (1.0 - wx) + br * wx
    return top * (1.0 - wy) + bot * wy


# ---------------------------------------------------------------------------
# Parameters (deterministic synthetic init; BN folded to eval-mode affine)
# ---------------------------------------------------------------------------
def conv_bn_params(key, kh, kw, cin, cout, bn=True, bias=False):
    k1, k2, k3 = jax.random.split(key, 3)
    fan_in = kh * kw * cin
    w = jax.random.normal(k1, (kh, kw, cin, cout), jnp.float32) / np.sqrt(fan_in)
    if bn:
        gamma = 1.0 + 0.1 * jax.random.normal(k2, (cout,), jnp.float32)
        beta = 0.1 * jax.random.normal(k3, (cout,), jnp.float32)
        rmean = jnp.zeros((cout,), jnp.float32)
        rvar = jnp.ones((cout,), jnp.float32)
        scale = gamma / jnp.sqrt(rvar + 1e-5)
        b = beta - rmean * scale
    elif bias:
        scale = jnp.ones((cout,), jnp.float32)
        b = 0.1 * jax.random.normal(k2, (cout,), jnp.float32)
    else:
        scale = jnp.ones((cout,), jnp.float32)
        b = jnp.zeros((cout,), jnp.float32)
    # weights are stored pre-cast to bf16 (MXU-native); scale/bias stay f32.
    return {'w': w.astype(jnp.bfloat16), 'scale': scale, 'bias': b,
            'kh': kh, 'kw': kw}


def strip_pooling_params(keys, in_channels):
    ic = in_channels // 4  # 256
    c = in_channels        # 1024
    return {
        'conv1_1': conv_bn_params(next(keys), 1, 1, c, ic),
        'conv1_2': conv_bn_params(next(keys), 1, 1, c, ic),
        'conv2_0': conv_bn_params(next(keys), 3, 3, ic, ic),
        'conv2_1': conv_bn_params(next(keys), 3, 3, ic, ic),
        'conv2_2': conv_bn_params(next(keys), 3, 3, ic, ic),
        'conv2_3': conv_bn_params(next(keys), 1, 3, ic, ic),
        'conv2_4': conv_bn_params(next(keys), 3, 1, ic, ic),
        'conv2_5': conv_bn_params(next(keys), 3, 3, ic, ic),
        'conv2_6': conv_bn_params(next(keys), 3, 3, ic, ic),
        'conv3':   conv_bn_params(next(keys), 1, 1, 2 * ic, c),
    }


def make_spnet_params(key, in_ch=14, n_classes=2):
    keys = iter(jax.random.split(key, 40))
    return {
        # backbone stand-in: space-to-depth(8) -> 1x1 conv to 2048 ch
        'backbone': conv_bn_params(next(keys), 1, 1, 8 * 8 * in_ch, 2048),
        'trans':    conv_bn_params(next(keys), 1, 1, 2048, 1024),
        'sp1':      strip_pooling_params(keys, 1024),
        'sp2':      strip_pooling_params(keys, 1024),
        'score1':   conv_bn_params(next(keys), 3, 3, 1024, 512),
        'score2':   conv_bn_params(next(keys), 1, 1, 512, n_classes,
                                   bn=False, bias=True),
    }


# ---------------------------------------------------------------------------
# Forward pass
# ---------------------------------------------------------------------------
def strip_pooling(x, p, pool_size=(20, 12)):
    """StripPooling.forward on NHWC input x (C = 1024)."""
    B, H, W, C = x.shape
    x1 = conv_bn(x, p['conv1_1'], relu=True)
    x2 = conv_bn(x, p['conv1_2'], relu=True)

    # branch A: square pools
    x2_2 = bilinear_resize(
        conv_bn(adaptive_avg_pool(x1, pool_size[0], pool_size[0]), p['conv2_1']),
        H, W)
    x2_3 = bilinear_resize(
        conv_bn(adaptive_avg_pool(x1, pool_size[1], pool_size[1]), p['conv2_2']),
        H, W)
    # relu(conv2_0(x1) + x2_2 + x2_3) fused into the Pallas epilogue
    x1b = conv_bn(x1, p['conv2_0'], residual=x2_2 + x2_3, relu=True)
    x1b = conv_bn(x1b, p['conv2_5'], relu=True)

    # branch B: strip pools
    # TODO(synk): conv2_3/conv2_4 act on tiny (B*W / B*H)-row strips; the per
    # pallas_call overhead is accepted here (they could be consolidated or left
    # to XLA at larger batch sizes).
    x2_4 = bilinear_resize(
        conv_bn(adaptive_avg_pool(x2, 1, W), p['conv2_3']), H, W)
    x2_5 = bilinear_resize(
        conv_bn(adaptive_avg_pool(x2, H, 1), p['conv2_4']), H, W)
    x2b = jnp.maximum(x2_4 + x2_5, 0.0)
    x2b = conv_bn(x2b, p['conv2_6'], relu=True)

    # relu(x + conv3(cat)) fused (residual + relu in kernel epilogue)
    out = conv_bn(jnp.concatenate([x1b, x2b], axis=-1), p['conv3'],
                  residual=x, relu=True)
    return out


def spnet_forward(x_nchw, params):
    B, Cin, H, W = x_nchw.shape
    x = jnp.transpose(x_nchw, (0, 2, 3, 1))  # -> NHWC

    # ---- backbone stand-in (stride-8 c4, 2048 channels) ----
    s = 8
    h8, w8 = H // s, W // s
    xs = x.reshape(B, h8, s, w8, s, Cin)
    xs = jnp.transpose(xs, (0, 1, 3, 2, 4, 5)).reshape(B, h8, w8, s * s * Cin)
    c4 = conv_bn(xs, params['backbone'], relu=True)          # (B, h8, w8, 2048)

    # ---- SPHead ----
    t = conv_bn(c4, params['trans'], relu=True)               # 2048 -> 1024
    t = strip_pooling(t, params['sp1'])
    t = strip_pooling(t, params['sp2'])
    sc = conv_bn(t, params['score1'], relu=True)              # 1024 -> 512 (3x3)
    # Dropout2d(0.1, False): eval-mode identity
    sc = conv_bn(sc, params['score2'], relu=False,
                 out_dtype=jnp.float32)                       # 512 -> n_classes

    # ---- final upsample back to input resolution ----
    out = bilinear_resize(sc, H, W)
    return jnp.transpose(out, (0, 3, 1, 2))                    # -> NCHW


if __name__ == "__main__":
    key = jax.random.PRNGKey(0)
    pkey, xkey = jax.random.split(key)
    params = make_spnet_params(pkey, in_ch=14, n_classes=2)

    x = jax.random.normal(xkey, (2, 14, 32, 32), jnp.float32)
    out = spnet_forward(x, params)
    out = jax.block_until_ready(out)

    assert out.shape == (2, 2, 32, 32), out.shape
    assert bool(jnp.all(jnp.isfinite(out)))
    print("KERNEL_OK")
</pallas_src>

<mosaic_0001>
module attributes {stable_mosaic.version = 11 : i64} {
  func.func @_mm_kernel(%arg0: i32, %arg1: i32, %arg2: i32, %arg3: memref<32x128xbf16, #tpu.memory_space<vmem>>, %arg4: memref<128x256xbf16, #tpu.memory_space<vmem>>, %arg5: memref<1x256xf32, #tpu.memory_space<vmem>>, %arg6: memref<1x256xf32, #tpu.memory_space<vmem>>, %arg7: memref<32x256xbf16, #tpu.memory_space<vmem>>, %arg8: memref<32x256xf32, #tpu.memory_space<vmem>>) attributes {dimension_semantics = [#tpu.dimension_semantics<parallel>, #tpu.dimension_semantics<parallel>, #tpu.dimension_semantics<arbitrary>], iteration_bounds = array<i64: 1, 8, 7>, scalar_prefetch = 0 : i64, scratch_operands = 1 : i64, tpu.core_type = #tpu.core_type<tc>, window_params = [{transform_indices = @transform_0, window_bounds = array<i64: 32, 128>}, {transform_indices = @transform_1, window_bounds = array<i64: 128, 256>}, {transform_indices = @transform_2, window_bounds = array<i64: 1, 256>}, {transform_indices = @transform_3, window_bounds = array<i64: 1, 256>}, {transform_indices = @transform_4, window_bounds = array<i64: 32, 256>}]} {
    %c0_i32 = arith.constant 0 : i32
    %0 = arith.cmpi eq, %arg2, %c0_i32 : i32
    %1 = arith.extui %0 : i1 to i32
    %c0_i32_0 = arith.constant 0 : i32
    %2 = arith.cmpi ne, %1, %c0_i32_0 : i32
    scf.if %2 {
      %cst_9 = arith.constant 0.000000e+00 : f32
      %12 = vector.broadcast %cst_9 : f32 to vector<32x256xf32>
      %c0_10 = arith.constant 0 : index
      %c0_11 = arith.constant 0 : index
      %13 = vector.load %arg8[%c0_10, %c0_11] : memref<32x256xf32, #tpu.memory_space<vmem>>, vector<32x256xf32>
      tpu.vector_store %arg8[%c0_10, %c0_11], %12 {strides = array<i32>} : memref<32x256xf32, #tpu.memory_space<vmem>>, vector<32x256xf32>,
    } else {
    }
    %c0 = arith.constant 0 : index
    %c0_1 = arith.constant 0 : index
    %3 = vector.load %arg8[%c0, %c0_1] : memref<32x256xf32, #tpu.memory_space<vmem>>, vector<32x256xf32>
    %c0_2 = arith.constant 0 : index
    %c0_3 = arith.constant 0 : index
    %4 = vector.load %arg3[%c0_2, %c0_3] : memref<32x128xbf16, #tpu.memory_space<vmem>>, vector<32x128xbf16>
    %c0_4 = arith.constant 0 : index
    %c0_5 = arith.constant 0 : index
    %5 = vector.load %arg4[%c0_4, %c0_5] : memref<128x256xbf16, #tpu.memory_space<vmem>>, vector<128x256xbf16>
    %cst = arith.constant dense<0.000000e+00> : vector<32x256xf32>
    %6 = tpu.matmul %4, %5, %cst {dimension_numbers = #tpu.dot_dimension_numbers<[1], [0], [0], [1], [0, 0, 1, 1], [], []>} : vector<32x128xbf16>, vector<128x256xbf16>, vector<32x256xf32> -> vector<32x256xf32>
    %7 = arith.addf %3, %6 : vector<32x256xf32>
    %c0_6 = arith.constant 0 : index
    %c0_7 = arith.constant 0 : index
    %8 = vector.load %arg8[%c0_6, %c0_7] : memref<32x256xf32, #tpu.memory_space<vmem>>, vector<32x256xf32>
    tpu.vector_store %arg8[%c0_6, %c0_7], %7 {strides = array<i32>} : memref<32x256xf32, #tpu.memory_space<vmem>>, vector<32x256xf32>,
    %c6_i32 = arith.constant 6 : i32
    %9 = arith.cmpi eq, %arg2, %c6_i32 : i32
    %10 = arith.extui %9 : i1 to i32
    %c0_i32_8 = arith.constant 0 : i32
    %11 = arith.cmpi ne, %10, %c0_i32_8 : i32
    scf.if %11 {
      %c0_9 = arith.constant 0 : index
      %c0_10 = arith.constant 0 : index
      %12 = vector.load %arg8[%c0_9, %c0_10] : memref<32x256xf32, #tpu.memory_space<vmem>>, vector<32x256xf32>
      %c0_11 = arith.constant 0 : index
      %c0_12 = arith.constant 0 : index
      %13 = vector.load %arg5[%c0_11, %c0_12] : memref<1x256xf32, #tpu.memory_space<vmem>>, vector<1x256xf32>
      %14 = vector.broadcast %13 : vector<1x256xf32> to vector<32x256xf32>
      %15 = arith.mulf %12, %14 : vector<32x256xf32>
      %c0_13 = arith.constant 0 : index
      %c0_14 = arith.constant 0 : index
      %16 = vector.load %arg6[%c0_13, %c0_14] : memref<1x256xf32, #tpu.memory_space<vmem>>, vector<1x256xf32>
      %17 = vector.broadcast %16 : vector<1x256xf32> to vector<32x256xf32>
      %18 = arith.addf %15, %17 : vector<32x256xf32>
      %cst_15 = arith.constant 0.000000e+00 : f32
      %19 = vector.broadcast %cst_15 : f32 to vector<32x256xf32>
      %20 = arith.maximumf %18, %19 : vector<32x256xf32>
      %21 = arith.truncf %20 : vector<32x256xf32> to vector<32x256xbf16>
      %c0_16 = arith.constant 0 : index
      %c0_17 = arith.constant 0 : index
      %22 = vector.load %arg7[%c0_16, %c0_17] : memref<32x256xbf16, #tpu.memory_space<vmem>>, vector<32x256xbf16>
      tpu.vector_store %arg7[%c0_16, %c0_17], %21 {strides = array<i32>} : memref<32x256xbf16, #tpu.memory_space<vmem>>, vector<32x256xbf16>,
    } else {
    }
    return
  }
  func.func @transform_0(%arg0: i32, %arg1: i32, %arg2: i32) -> (i32, i32) {
    %c0_i32 = arith.constant 0 : i32
    return %arg0, %arg2 : i32, i32
  }
  func.func @transform_1(%arg0: i32, %arg1: i32, %arg2: i32) -> (i32, i32) {
    %c0_i32 = arith.constant 0 : i32
    return %arg2, %arg1 : i32, i32
  }
  func.func @transform_2(%arg0: i32, %arg1: i32, %arg2: i32) -> (i32, i32) {
    %c0_i32 = arith.constant 0 : i32
    %c0_i32_0 = arith.constant 0 : i32
    return %c0_i32, %arg1 : i32, i32
  }
  func.func @transform_3(%arg0: i32, %arg1: i32, %arg2: i32) -> (i32, i32) {
    %c0_i32 = arith.constant 0 : i32
    %c0_i32_0 = arith.constant 0 : i32
    return %c0_i32, %arg1 : i32, i32
  }
  func.func @transform_4(%arg0: i32, %arg1: i32, %arg2: i32) -> (i32, i32) {
    %c0_i32 = arith.constant 0 : i32
    return %arg0, %arg1 : i32, i32
  }
}

</mosaic_0001>

<bundles_post_ra>
// kernel: tpu_custom_call.1
= control target key start
LH: loop header
LB: loop body
LE: loop exit
PB: predicated region body
PF: predicated region fallthrough
CT: control target
= control target key end

     0   :  { %s1747_s0 = inlined_call_operand.hbm [shape: bf16[32,896], index: 0, kind: input, shape index: {}]   ;;  %s1748_s1 = inlined_call_operand.hbm [shape: bf16[896,2048], index: 1, kind: input, shape index: {}]   ;;  %s1749_s2 = inlined_call_operand.hbm [shape: f32[1,2048], index: 2, kind: input, shape index: {}]   ;;  %s1750_s3 = inlined_call_operand.hbm [shape: f32[1,2048], index: 3, kind: input, shape index: {}]   ;;  %s1751_s4 = inlined_call_operand.hbm [shape: bf16[32,2048], index: 4, kind: output, shape index: {}]  }
   0x1   :  { %1760 = sst [smem:[#allocation28_spill]] %s1747_s0 }
   0x2   :  { %1761 = sst [smem:[#allocation29_spill]] %s1748_s1 }
   0x3   :  { %1762 = sst [smem:[#allocation30_spill]] %s1751_s4 }
   0x4   :  { %9 = vsyncpa [#allocation4], 0 }
   0x5   :  { %11 = vsyncpa [#allocation4 + $0x1], 0 }
   0x6   :  { %12 = vsyncpa [#allocation7], 0 }
   0x7   :  { %14 = vsyncpa [#allocation7 + $0x1], 0 }
   0x8   :  { %15 = vsyncpa [#allocation10], 0 }
   0x9   :  { %17 = vsyncpa [#allocation10 + $0x1], 0 }
   0xa   :  { %18 = vsyncpa [#allocation5], 0 }
   0xb   :  { %20 = vsyncpa [#allocation5 + $0x1], 0  ;;  %s1396_s15 = smov 0   ;;  %s1398_s16 = smov 0  }
   0xc   :  { %s1400_s17 = smov 0   ;;  %s1402_s18 = smov 0  }
   0xd   :  { %s1404_s19 = smov 0   ;;  %s1406_s20 = smov 0  }
   0xe   :  { %s1408_s21 = smov 0   ;;  %s1410_s22 = smov 0  }
   0xf   :  { %s1412_s23 = smov 0   ;;  %s1414_s24 = smov 0  }
  0x10   :  { %s1416_s25 = smov 0   ;;  %s1418_s26 = smov 0  }
  0x11   :  { %s1420_s27 = smov 0   ;;  %s1422_s28 = smov 0  }
  0x12 LB: > { %1763 = sst [smem:[#allocation17_spill]] %s1327_s20  ;;  %s38_s29 = sadd.s32 1, %s1351_s26  ;;  %s1359_s28 = sphi %s1422_s28, %s26_s28   ;;  %s1355_s27 = sphi %s1420_s27, %s1797_s27   ;;  %s1351_s26 = sphi %s1418_s26, %s1796_s26   ;;  %s1347_s25 = sphi %s1416_s25, %s1795_s25   ;;  %s1343_s24 = sphi %s1414_s24, %s1794_s24   ;;  %s1339_s23 = sphi %s1412_s23, %s1793_s23   ;;  %s1335_s22 = sphi %s1410_s22, %s1804_s22   ;;  %s1331_s21 = sphi %s1408_s21, %s1803_s21   ;;  %s1327_s20 = sphi %s1406_s20, %s1791_s20   ;;  %s1323_s19 = sphi %s1404_s19, %s1802_s19   ;;  %s1319_s18 = sphi %s1402_s18, %s1801_s18   ;;  %s1315_s17 = sphi %s1400_s17, %s1800_s17   ;;  %s1311_s16 = sphi %s1398_s16, %s1799_s16   ;;  %s1307_s15 = sphi %s1396_s15, %s1798_s15  }
  0x13   : > { %1764 = sst [smem:[#allocation18_spill]] %s1339_s23  ;;  %s41_s30 = sadd.s32 1, %s1355_s27 }
  0x14   : > { %1765 = sst [smem:[#allocation19_spill]] %s1343_s24  ;;  %p39_p0 = scmp.ge.s32.totalorder %s38_s29, 7 }
  0x15   : > { %1766 = sst [smem:[#allocation20_spill]] %s1347_s25  ;;  %p62_p1 = scmp.eq.s32.totalorder %s1359_s28, 0 }
  0x16   : > { %1767 = sst [smem:[#allocation21_spill]] %s1351_s26  ;;  %s82_s5 = sadd.s32 1, %s1327_s20 }
  0x17   : > { %1768 = sst [smem:[#allocation22_spill]] %s1355_s27  ;;  %p89_p2 = scmp.ne.s32.totalorder %s1327_s20, %s1323_s19 }
  0x18   : > { %s1806_s29 = smov (%p39_p0, %s38_s29), 0  ;;  %s1808_s30 = smov (!%p39_p0, %s41_s30), %s1355_s27 }
  0x19   : > { %1769 = sst [smem:[#allocation23_spill]] %s1806_s29  ;;  %s1477_s6 = ssub.s32 %s1351_s26, %s1806_s29 }
  0x1a   : > { %p1481_p3 = por %p89_p2, %p62_p1  ;;  %p43_p4 = scmp.ge.s32.totalorder %s1808_s30, 8 }
  0x1b   : > { %p52_p5 = scmp.eq.s32.totalorder %s1477_s6, 0  ;;  %p95_p6 = scmp.ne.s32.totalorder %s1323_s19, %s1319_s18 }
  0x1c   : > { %s1810_s30 = smov (%p43_p4, %s1808_s30), 0  ;;  %p1756_p7 = scmp.lt.s32.totalorder %s1359_s28, 56 }
  0x1d   : > { %1771 = sst [smem:[#allocation24_spill]] %s1810_s30  ;;  %s223_s8 = sand.u32 1, %s1359_s28  }
  0x1e   : > { %s1494_s9 = ssub.s32 %s1355_s27, %s1810_s30  ;;  %s225_s11 = sand.u32 1, %s1327_s20  }
  0x1f   : > { %s79_s10 = sor.u32 %s1494_s9, %s1477_s6  ;;  %s800_s12 = sshll.u32 %s225_s11, 7 }
  0x20   : > { %p80_p8 = scmp.eq.s32.totalorder %s79_s10, 0  ;;  %s1500_s13 = sshll.u32 %s1355_s27, 1 }
  0x21   : > { %s894_s29 = sshll.u32 %s1351_s26, 8  ;;  %s227_s4 = scalar_lea.vmem [#allocation6], %s800_s12 }
  0x22   : > { %s1503_s14 = scalar_select %p80_p8, %s1327_s20, %s82_s5  }
  0x23   : > { %s238_s25 = sshll.u32 %s227_s4, 4  ;;  %s233_s24 = sadd.s32 %s894_s29, %s1500_s13  ;;  %s239_s25 = int_to_ptr.vmem [resolvable:$true] %s238_s25 }
  0x24   : > { %1772 = sst [smem:[#allocation25_spill]] %s1503_s14  ;;  %s804_s30 = sshll.u32 %s233_s24, 2 }
  0x25   : > { %p944_p9 = pnand %p1756_p7, %p1481_p3  ;;  %s1773_s1 = sld [smem:[#allocation29_spill]] }
  0x26   : > { %p809_p10 = scmp.ge.s32.totalorder %s1359_s28, 1  ;;  %s1515_s29 = scalar_lea.sflag [#allocation7], %s223_s8 }
  0x27   : > { %s1361_s12 = smov 1024   ;;  %s1362_s24 = smov 128  }
  0x28   : > { %s1363_s7 = smov 8   ;;  %p284_p11 = scmp.lt.s32.totalorder %s1359_s28, 57 }
  0x29   : > { %s54_s10 = sadd.s32 1, %s1339_s23  ;;  %p61_p13 = scmp.ne.s32.totalorder %s1339_s23, %s1335_s22 }
  0x2a   : > { %p1519_p12 = pnand %p809_p10, %p284_p11  ;;  %p67_p2 = scmp.ne.s32.totalorder %s1335_s22, %s1331_s21 }
  0x2b   : > { %s235_s5 = scalar_lea.hbm %s1773_s1, %s804_s30  ;;  %p63_p0 = por %p62_p1, %p61_p13 }
  0x2c   : > { %s236_s4 = sshll.u32 %s235_s5, 4  ;;  %s199_s8 = sand.u32 1, %s1339_s23   ;;  %s237_s4 = int_to_ptr.hbm [resolvable:$true] %s236_s4 }
  0x2d   : > { %946 = dma.hbm_to_vmem [thread:$0]  (!%p944_p9), %s237_s4, 2048, %s239_s25, %s1515_s29, %s1361_s12, %s1362_s24, %s1363_s7  }
  0x2e   : > { %s1529_s30 = scalar_select %p52_p5, %s1339_s23, %s54_s10  }
  0x2f   : > { %s799_s11 = sshll.u32 %s1351_s26, 2  ;;  %s798_s5 = sshll.u32 %s199_s8, 4 }
  0x30   : > { %1775 = sst [smem:[#allocation26_spill]] %s1529_s30  ;;  %s203_s6 = scalar_lea.vmem [#allocation3], %s798_s5 }
  0x31   : > { %s1776_s0 = sld [smem:[#allocation28_spill]]  ;;  %s213_s7 = sshll.u32 %s203_s6, 4  ;;  %s214_s7 = int_to_ptr.vmem [resolvable:$true] %s213_s7 }
  0x32   : > { %p941_p3 = pnand %p1756_p7, %p63_p0  ;;  %s200_s10 = scalar_lea.sflag [#allocation4], %s199_s8 }
  0x33   : > { %s1364_s25 = smov 448   ;;  %s1366_s4 = smov 4  }
  0x34   : > { %s795_s5 = sadd.s32 4294967294, %s1359_s28   ;;  %p106_p5 = scmp.eq.s32.totalorder %s1494_s9, 0 }
  0x35   : > { %s108_s6 = sadd.s32 1, %s1315_s17  ;;  %p115_p10 = scmp.ne.s32.totalorder %s1315_s17, %s1311_s16 }
  0x36   : > { %p121_p11 = scmp.ne.s32.totalorder %s1311_s16, %s1307_s15  ;;  %p179_p0 = scmp.eq.s32.totalorder %s795_s5, 55 }
  0x37   : > { %s210_s12 = scalar_lea.hbm %s1776_s0, %s799_s11  ;;  %s1365_s11 = smov 64  }
  0x38   : > { %s211_s24 = sshll.u32 %s210_s12, 4  ;;  %s1543_s12 = sadd.s32 4294967295, %s1359_s28   ;;  %s212_s24 = int_to_ptr.hbm [resolvable:$true] %s211_s24 }
  0x39   : > { %943 = dma.hbm_to_vmem [thread:$0]  (!%p941_p3), %s212_s24, 256, %s214_s7, %s200_s10, %s1364_s25, %s1365_s11, %s1366_s4  }
  0x3a   : > { %p68_p4 = scmp.eq.s32.totalorder %s1543_s12, 0  ;;  %p173_p13 = scmp.eq.s32.totalorder %s1543_s12, 55 }
  0x3b   : > { %s1564_s24 = scalar_select %p106_p5, %s1315_s17, %s108_s6  }
  0x3c   : > { %p1552_p8 = por %p68_p4, %p67_p2  ;;  %p1559_p9 = por %p95_p6, %p68_p4 }
  0x3d   : > { %1779 = sst [smem:[#allocation27_spill]] %s1564_s24  ;;  %p117_p3 = por %p115_p10, %p62_p1 }
  0x3e   : > { %p1573_p2 = por %p121_p11, %p68_p4  ;;  %p1577_p7 = por %p173_p13, %p115_p10 }
  0x3f   : > { %p1581_p6 = por %p179_p0, %p121_p11  ;;  %s250_s7 = sand.u32 1, %s1315_s17  }
  0x40   : > { %s256_s11 = scalar_lea.hbm %s1749_s2, %s1500_s13  ;;  %s805_s4 = sshll.u32 %s250_s7, 1 }
  0x41   : > { %s258_s5 = sshll.u32 %s256_s11, 4  ;;  %s252_s6 = scalar_lea.vmem [#allocation8], %s805_s4  ;;  %s259_s5 = int_to_ptr.hbm [resolvable:$true] %s258_s5 }
  0x42   : > { %s260_s1 = sshll.u32 %s252_s6, 4  ;;  %p1783_p1 = scmp.lt.s32.totalorder %s1359_s28, 56  ;;  %s261_s1 = int_to_ptr.vmem [resolvable:$true] %s260_s1 }
  0x43   : > { %s275_s23 = scalar_lea.hbm %s1750_s3, %s1500_s13  ;;  %s271_s14 = scalar_lea.vmem [#allocation9], %s805_s4 }
  0x44   : > { %p947_p4 = pnand %p1783_p1, %p117_p3  ;;  %s279_s20 = sshll.u32 %s271_s14, 4  ;;  %s280_s20 = int_to_ptr.vmem [resolvable:$true] %s279_s20 }
  0x45   : > { %s277_s24 = sshll.u32 %s275_s23, 4  ;;  %s268_s10 = scalar_lea.sflag [#allocation10], %s250_s7  ;;  %s278_s24 = int_to_ptr.hbm [resolvable:$true] %s277_s24 }
  0x46   : > { %949 = dma.hbm_to_vmem [thread:$0]  (!%p947_p4), %s259_s5, 32, %s261_s1, %s1515_s29  }
  0x47   : > { %952 = dma.hbm_to_vmem [thread:$0]  (!%p947_p4), %s278_s24, 32, %s280_s20, %s268_s10  }
  0x48   : > { %288 = sbr.rel (%p1519_p12) target bundleno = 327 (0x147), region = 36  ;;  %s290_s25 = sand.u32 (!%p1519_p12), 1, %s1335_s22  }
  0x49   : > { %s1600_s11 = sshll.u32 (!%p1519_p12), %s290_s25, 4  ;;  %s291_s1 = scalar_lea.sflag (!%p1519_p12), [#allocation4], %s290_s25 }
  0x4a   : > { %s294_s29 = scalar_lea.vmem (!%p1519_p12), [#allocation3], %s1600_s11 }
  0x4d   : > { %1286 = dma.done.wait (%p1552_p8), %s291_s1, 256  }
  0x4e   : > { %1288 = vsyncadd (%p1552_p8), %s291_s1, 4294967040  ;;  %s300_s20 = sand.u32 1, %s1543_s12   ;;  %s302_s23 = sand.u32 1, %s1323_s19  }
  0x4f   : > { %s811_s26 = sshll.u32 %s302_s23, 7  ;;  %s301_s27 = scalar_lea.sflag [#allocation7], %s300_s20 }
  0x50   : > { %s1609_s13 = scalar_lea.vmem [#allocation6], %s811_s26 }
  0x51   : > { %1290 = dma.done.wait (%p1559_p9), %s301_s27, 2048  }
  0x52   : > { %1292 = vsyncadd (%p1559_p9), %s301_s27, 4294965248  ;;  %s1616_s14 = sand.u32 1, %s1311_s16  }
  0x53   : > { %s812_s0 = sshll.u32 %s1616_s14, 1 }
  0x54   : > { %s1619_s30 = scalar_lea.vmem [#allocation8], %s812_s0 }
  0x55   : > { %1294 = dma.done.wait (%p1573_p2), %s301_s27, 32  }
  0x56   : > { %1296 = vsyncadd (%p1573_p2), %s301_s27, 4294967264  ;;  %s321_s12 = scalar_lea.sflag [#allocation10], %s1616_s14  ;;  %s1626_s24 = scalar_lea.vmem [#allocation9], %s812_s0 }
  0x57   : > { %1298 = dma.done.wait (%p1573_p2), %s321_s12, 32  }
  0x58   : > { %1300 = vsyncadd (%p1573_p2), %s321_s12, 4294967264  ;;  %s814_s8 = sshll.u32 %s1616_s14, 5  ;;  %s1784_s4 = sld [smem:[#allocation19_spill]] }
  0x59   : > { %s1633_s7 = scalar_lea.vmem [#allocation11], %s814_s8 }
  0x5e   : > { %p815_p12 = scmp.ne.s32.totalorder %s1784_s4, 0 }
  0x60   : > { %375 = sbr.rel (%p815_p12) target bundleno = 110 (0x6e), region = 56 }
  0x65   : > { %v1367_v0 = vmov 0.0  }
  0x66   : > { %376 = vst [vmem:[#allocation2 + $0x30] sm:$0xff] %v1367_v0 }
  0x67   : > { %377 = vst [vmem:[#allocation2] sm:$0xff] %v1367_v0 }
  0x68   : > { %378 = vst [vmem:[#allocation2 + $0x18] sm:$0xff] %v1367_v0 }
  0x69   : > { %379 = vst [vmem:[#allocation2 + $0x10] sm:$0xff] %v1367_v0 }
  0x6a   : > { %380 = vst [vmem:[#allocation2 + $0x8] sm:$0xff] %v1367_v0 }
  0x6b   : > { %381 = vst [vmem:[#allocation2 + $0x20] sm:$0xff] %v1367_v0 }
  0x6c   : > { %382 = vst [vmem:[#allocation2 + $0x28] sm:$0xff] %v1367_v0 }
  0x6d   : > { %383 = vst [vmem:[#allocation2 + $0x38] sm:$0xff] %v1367_v0 }
  0x6e PF: > { %v882_v1 = vld [vmem:[%s1609_s13 + $0x70] sm:$0xf]  ;;  %v912_v2 = vld [vmem:[%s1609_s13 + $0x74] sm:$0xf0]  ;;  %v911_v3 = vld [vmem:[%s1609_s13 + $0x74] sm:$0xf] }
  0x6f   : > { %v883_v4 = vor.u32 %v912_v2, %v882_v1  ;;  %v884_v5 = vld [vmem:[%s1609_s13 + $0x78] sm:$0xf0]  ;;  %v874_v6 = vld [vmem:[%s1609_s13 + $0x60] sm:$0xf]  ;;  %v910_v7 = vld [vmem:[%s1609_s13 + $0x64] sm:$0xf0] }
  0x70   : > { %v887_v8 = vor.u32 %v911_v3, %v884_v5  ;;  %v909_v9 = vld [vmem:[%s1609_s13 + $0x64] sm:$0xf]  ;;  %v876_v10 = vld [vmem:[%s1609_s13 + $0x68] sm:$0xf0]  ;;  %v875_v11 = vor.u32 %v910_v7, %v874_v6  ;;  %v866_v13 = vld [vmem:[%s1609_s13 + $0x50] sm:$0xf] }
  0x71   : > { %504 = vmatpush.bf16.msra.mxu0 %v883_v4  ;;  %914 = vmatpush.bf16.msra.mxu2 %v883_v4  ;;  %v879_v12 = vor.u32 %v909_v9, %v876_v10  ;;  %v908_v14 = vld [vmem:[%s1609_s13 + $0x54] sm:$0xf0]  ;;  %v907_v15 = vld [vmem:[%s1609_s13 + $0x54] sm:$0xf]  ;;  %v868_v16 = vld [vmem:[%s1609_s13 + $0x58] sm:$0xf0] }
  0x72   : > { %523 = vmatpush.bf16.msra.mxu1 %v887_v8  ;;  %922 = vmatpush.bf16.msra.mxu3 %v887_v8  ;;  %v867_v17 = vor.u32 %v908_v14, %v866_v13  ;;  %v871_v18 = vor.u32 %v907_v15, %v868_v16  ;;  %v858_v19 = vld [vmem:[%s1609_s13 + $0x40] sm:$0xf]  ;;  %v906_v20 = vld [vmem:[%s1609_s13 + $0x44] sm:$0xf0]  ;;  %v905_v21 = vld [vmem:[%s1609_s13 + $0x44] sm:$0xf] }
  0x73   : > { %v860_v22 = vld [vmem:[%s1609_s13 + $0x48] sm:$0xf0]  ;;  %v859_v23 = vor.u32 %v906_v20, %v858_v19  ;;  %v850_v25 = vld [vmem:[%s1609_s13 + $0x30] sm:$0xf]  ;;  %v904_v26 = vld [vmem:[%s1609_s13 + $0x34] sm:$0xf0] }
  0x74   : > { %v863_v24 = vor.u32 %v905_v21, %v860_v22  ;;  %v903_v27 = vld [vmem:[%s1609_s13 + $0x34] sm:$0xf]  ;;  %v852_v28 = vld [vmem:[%s1609_s13 + $0x38] sm:$0xf0]  ;;  %v851_v29 = vor.u32 %v904_v26, %v850_v25  ;;  %v842_v31 = vld [vmem:[%s1609_s13 + $0x20] sm:$0xf] }
  0x75   : > { %505 = vmatpush.bf16.msra.mxu0 %v875_v11  ;;  %915 = vmatpush.bf16.msra.mxu2 %v875_v11  ;;  %v855_v30 = vor.u32 %v903_v27, %v852_v28  ;;  %v902_v32 = vld [vmem:[%s1609_s13 + $0x24] sm:$0xf0]  ;;  %v901_v33 = vld [vmem:[%s1609_s13 + $0x24] sm:$0xf]  ;;  %v844_v34 = vld [vmem:[%s1609_s13 + $0x28] sm:$0xf0] }
  0x76   : > { %524 = vmatpush.bf16.msra.mxu1 %v879_v12  ;;  %923 = vmatpush.bf16.msra.mxu3 %v879_v12  ;;  %v843_v35 = vor.u32 %v902_v32, %v842_v31  ;;  %v847_v36 = vor.u32 %v901_v33, %v844_v34  ;;  %v834_v37 = vld [vmem:[%s1609_s13 + $0x10] sm:$0xf]  ;;  %v900_v38 = vld [vmem:[%s1609_s13 + $0x14] sm:$0xf0]  ;;  %v899_v39 = vld [vmem:[%s1609_s13 + $0x14] sm:$0xf] }
  0x77   : > { %v836_v40 = vld [vmem:[%s1609_s13 + $0x18] sm:$0xf0]  ;;  %v835_v41 = vor.u32 %v900_v38, %v834_v37  ;;  %v826_v43 = vld [vmem:[%s1609_s13] sm:$0xf]  ;;  %v898_v44 = vld [vmem:[%s1609_s13 + $0x4] sm:$0xf0] }
  0x78   : > { %v839_v42 = vor.u32 %v899_v39, %v836_v40  ;;  %v897_v45 = vld [vmem:[%s1609_s13 + $0x4] sm:$0xf]  ;;  %v828_v46 = vld [vmem:[%s1609_s13 + $0x8] sm:$0xf0]  ;;  %v827_v47 = vor.u32 %v898_v44, %v826_v43  ;;  %v384_v51 = vld [vmem:[#allocation2 + $0x30] sm:$0xff]  ;;  %s1785_s21 = sld [smem:[#allocation19_spill]] }
  0x79   : > { %506 = vmatpush.bf16.msra.mxu0 %v867_v17  ;;  %916 = vmatpush.bf16.msra.mxu2 %v867_v17  ;;  %v831_v48 = vor.u32 %v897_v45, %v828_v46  ;;  %v895_v49 = vld [vmem:[%s294_s29] sm:$0xff]  ;;  %v896_v50 = vld [vmem:[%s294_s29 + $0x8] sm:$0xff] }
  0x7a   : > { %525 = vmatpush.bf16.msra.mxu1 %v871_v18  ;;  %924 = vmatpush.bf16.msra.mxu3 %v871_v18  ;;  %v385_v52 = vld [vmem:[#allocation2] sm:$0xff]  ;;  %v388_v57 = vld [vmem:[#allocation2 + $0x8] sm:$0xff]  ;;  %v386_v60 = vld [vmem:[#allocation2 + $0x18] sm:$0xff] }
  0x7b   : > { %v389_v58 = vld [vmem:[#allocation2 + $0x20] sm:$0xff]  ;;  %v387_v63 = vld [vmem:[#allocation2 + $0x10] sm:$0xff]  ;;  %v390_v5 = vld [vmem:[#allocation2 + $0x28] sm:$0xff] }
  0x7c   : > { %v391_v6 = vld [vmem:[#allocation2 + $0x38] sm:$0xff] }
  0x7d   : > { %507 = vmatpush.bf16.msra.mxu0 %v859_v23  ;;  %917 = vmatpush.bf16.msra.mxu2 %v859_v23 }
  0x7e   : > { %526 = vmatpush.bf16.msra.mxu1 %v863_v24  ;;  %925 = vmatpush.bf16.msra.mxu3 %v863_v24  ;;  %p888_p5 = scmp.ne.s32.totalorder %s1785_s21, 6 }
  0x81   : > { %508 = vmatpush.bf16.msra.mxu0 %v851_v29  ;;  %918 = vmatpush.bf16.msra.mxu2 %v851_v29 }
  0x82   : > { %527 = vmatpush.bf16.msra.mxu1 %v855_v30  ;;  %926 = vmatpush.bf16.msra.mxu3 %v855_v30 }
  0x85   : > { %509 = vmatpush.bf16.msra.mxu0 %v843_v35  ;;  %919 = vmatpush.bf16.msra.mxu2 %v843_v35 }
  0x86   : > { %528 = vmatpush.bf16.msra.mxu1 %v847_v36  ;;  %927 = vmatpush.bf16.msra.mxu3 %v847_v36 }
  0x89   : > { %510 = vmatpush.bf16.msra.mxu0 %v835_v41  ;;  %920 = vmatpush.bf16.msra.mxu2 %v835_v41 }
  0x8a   : > { %529 = vmatpush.bf16.msra.mxu1 %v839_v42  ;;  %928 = vmatpush.bf16.msra.mxu3 %v839_v42 }
  0x8d   : > { %511 = vmatpush.bf16.msra.mxu0 %v827_v47  ;;  %921 = vmatpush.bf16.msra.mxu2 %v827_v47 }
  0x8e   : > { %530 = vmatpush.bf16.msra.mxu1 %v831_v48  ;;  %929 = vmatpush.bf16.msra.mxu3 %v831_v48 }
  0x90   : > { %512 = vmatmul.bf16.vlgmr.msra.gmra.mxu0 %v895_v49  ;;  %517 = vmatmul.bf16.vlgmr.msra.gmra.mxu2 %v896_v50 }
  0x91   : > { %531 = vmatmul.bf16.vlgmr.msra.gmra.mxu1 %v895_v49  ;;  %536 = vmatmul.bf16.vlgmr.msra.gmra.mxu3 %v896_v50 }
 0x10d   : > { %v513_v53 = vpop.f32.mrf.mxu0 }
 0x10e   : > { %v542_v54 = vadd.f32 %v513_v53, %v384_v51  ;;  %v532_v55 = vpop.f32.mrf.mxu1 }
 0x10f   : > { %v543_v56 = vadd.f32 %v532_v55, %v385_v52 }
 0x110   : > { %550 = vst [vmem:[#allocation2 + $0x30] sm:$0xff] %v542_v54 }
 0x111   : > { %551 = vst [vmem:[#allocation2] sm:$0xff] %v543_v56 }
 0x113   : > { %v518_v59 = vpop.f32.mrf.mxu2 }
 0x114   : > { %v546_v61 = vadd.f32 %v518_v59, %v388_v57  ;;  %v537_v62 = vpop.f32.mrf.mxu3 }
 0x115   : > { %v547_v0 = vadd.f32 %v537_v62, %v389_v58  ;;  %v515_v1 = vpop.f32.mrf.mxu0 }
 0x116   : > { %554 = vst [vmem:[#allocation2 + $0x8] sm:$0xff] %v546_v61  ;;  %v544_v2 = vadd.f32 %v515_v1, %v386_v60  ;;  %v534_v3 = vpop.f32.mrf.mxu1 }
 0x117   : > { %555 = vst [vmem:[#allocation2 + $0x20] sm:$0xff] %v547_v0  ;;  %v545_v4 = vadd.f32 %v534_v3, %v387_v63 }
 0x118   : > { %552 = vst [vmem:[#allocation2 + $0x18] sm:$0xff] %v544_v2 }
 0x119   : > { %553 = vst [vmem:[#allocation2 + $0x10] sm:$0xff] %v545_v4 }
 0x11b   : > { %v520_v7 = vpop.f32.mrf.mxu2  ;;  %561 = sbr.rel (%p888_p5) target bundleno = 304 (0x130), region = 60 }
 0x11c   : > { %v548_v8 = vadd.f32 %v520_v7, %v390_v5  ;;  %v539_v9 = vpop.f32.mrf.mxu3 }
 0x11d   : > { %v549_v10 = vadd.f32 %v539_v9, %v391_v6 }
 0x11e   : > { %556 = vst [vmem:[#allocation2 + $0x28] sm:$0xff] %v548_v8 }
 0x11f   : > { %557 = vst [vmem:[#allocation2 + $0x38] sm:$0xff] %v549_v10 }
 0x120   : > { %v562_v11 = vld [vmem:[#allocation2 + $0x30] sm:$0xff]  ;;  %v563_v12 = vld [vmem:[#allocation2] sm:$0xff]  ;;  %v564_v17 = vld [vmem:[#allocation2 + $0x18] sm:$0xff] }
 0x121   : > { %v570_v13 = vld [vmem:[%s1619_s30] sm:$0x3]  ;;  %v584_v16 = vld [vmem:[%s1626_s24] sm:$0x3]  ;;  %v565_v18 = vld [vmem:[#allocation2 + $0x10] sm:$0xff] }
 0x122   : > { %v572_v14 = vperm.slane %v570_v13, 0  ;;  %v573_v15 = vperm.slane %v570_v13, 1  ;;  %v586_v19 = vperm.slane %v584_v16, 0  ;;  %v587_v20 = vperm.slane %v584_v16, 1  ;;  %v566_v21 = vld [vmem:[#allocation2 + $0x8] sm:$0xff]  ;;  %v567_v22 = vld [vmem:[#allocation2 + $0x20] sm:$0xff] }
 0x124   : > { %v576_v24 = vmul.f32 %v572_v14, %v562_v11  ;;  %v577_v25 = vmul.f32 %v573_v15, %v563_v12  ;;  %v578_v26 = vmul.f32 %v572_v14, %v564_v17  ;;  %v579_v27 = vmul.f32 %v573_v15, %v565_v18 }
 0x125   : > { %v568_v23 = vld [vmem:[#allocation2 + $0x28] sm:$0xff]  ;;  %v580_v29 = vmul.f32 %v572_v14, %v566_v21  ;;  %v581_v30 = vmul.f32 %v573_v15, %v567_v22 }
 0x126   : > { %v569_v28 = vld [vmem:[#allocation2 + $0x38] sm:$0xff]  ;;  %v582_v31 = vmul.f32 %v572_v14, %v568_v23  ;;  %v590_v33 = vadd.f32 %v586_v19, %v576_v24  ;;  %v591_v34 = vadd.f32 %v587_v20, %v577_v25  ;;  %v592_v35 = vadd.f32 %v586_v19, %v578_v26 }
 0x127   : > { %v583_v32 = vmul.f32 %v573_v15, %v569_v28  ;;  %v593_v36 = vadd.f32 %v587_v20, %v579_v27  ;;  %v594_v37 = vadd.f32 %v586_v19, %v580_v29  ;;  %v595_v38 = vadd.f32 %v587_v20, %v581_v30 }
 0x128   : > { %v596_v39 = vadd.f32 %v586_v19, %v582_v31  ;;  %v598_v41 = vmax.f32 %v590_v33, 0.0  ;;  %v599_v42 = vmax.f32 %v591_v34, 0.0  ;;  %v600_v43 = vmax.f32 %v592_v35, 0.0 }
 0x129   : > { %v597_v40 = vadd.f32 %v587_v20, %v583_v32  ;;  %v601_v44 = vmax.f32 %v593_v36, 0.0  ;;  %v602_v45 = vmax.f32 %v594_v37, 0.0  ;;  %v603_v46 = vmax.f32 %v595_v38, 0.0 }
 0x12a   : > { %v604_v47 = vmax.f32 %v596_v39, 0.0  ;;  %v606_v49 = vpack.c.bf16 %v599_v42, %v598_v41 }
 0x12b   : > { %v605_v48 = vmax.f32 %v597_v40, 0.0  ;;  %v607_v50 = vpack.c.bf16 %v601_v44, %v600_v43  ;;  %v608_v51 = vpack.c.bf16 %v603_v46, %v602_v45 }
 0x12c   : > { %610 = vst [vmem:[%s1633_s7] sm:$0xff] %v606_v49 }
 0x12d   : > { %v609_v52 = vpack.c.bf16 %v605_v48, %v604_v47  ;;  %611 = vst [vmem:[%s1633_s7 + $0x8] sm:$0xff] %v607_v50 }
 0x12e   : > { %612 = vst [vmem:[%s1633_s7 + $0x10] sm:$0xff] %v608_v51 }
 0x12f   : > { %613 = vst [vmem:[%s1633_s7 + $0x18] sm:$0xff] %v609_v52 }
 0x130 PF: > { %s1786_s5 = sld [smem:[#allocation20_spill]]  ;;  %s630_s29 = sshll.u32 %s1633_s7, 4  ;;  %s631_s29 = int_to_ptr.vmem [resolvable:$true] %s630_s29 }
 0x131   : > { %s1787_s11 = sld [smem:[#allocation30_spill]]  ;;  %s615_s23 = scalar_lea.sflag [#allocation5], %s1616_s14 }
 0x136   : > { %s913_s6 = sshll.u32 %s1786_s5, 3 }
 0x137   : > { %s629_s1 = scalar_lea.hbm %s1787_s11, %s913_s6  ;;  %s1221_s30 = scalar_lea.hbm %s1787_s11, 256 }
 0x138   : > { %s632_s20 = sshll.u32 %s629_s1, 4  ;;  %s633_s20 = int_to_ptr.hbm [resolvable:$true] %s632_s20 }
 0x139   : > { %s1215_s26 = sshra.s32 %s633_s20, 4  ;;  %s1216_s26 = int_to_ptr.hbm [resolvable:$true] %s1215_s26 }
 0x13a   : > { %s1217_s27 = scalar_lea.hbm %s1216_s26, 32  ;;  %p1222_p11 = scmp.lt.s32.totalorder %s1216_s26, %s1787_s11 }
 0x13b   : > { %p1218_p8 = scmp.ne.s32.totalorder %s1216_s26, %s1217_s27  ;;  %p1223_p13 = scmp.lt.s32.totalorder %s1221_s30, %s1217_s27 }
 0x13d   : > { %p1219_p9 = pnand %p1218_p8, %p1577_p7  ;;  %p1224_p0 = por %p1223_p13, %p1222_p11 }
 0x13f   : > { %p1220_p10 = pneg %p1219_p9 }
 0x141   : > { %p1225_p3 = pnand %p1224_p0, %p1220_p10 }
 0x143   : > { %1228 = shalt.err (!%p1225_p3)
}
 0x144   : > { %s1368_s14 = smov 128   ;;  %s1369_s8 = smov 1024  }
 0x145   : > { %s1370_s7 = smov 8  }
 0x146   : > { %938 = dma.vmem_to_hbm [thread:$0]  (%p1577_p7), %s631_s29, 512, %s633_s20, %s615_s23, %s1368_s14, %s1369_s8, %s1370_s7  }
 0x147 PF: > { %p958_p2 = scmp.ge.s32.totalorder %s1359_s28, 2  ;;  %s647_s4 = sand.u32 1, %s1307_s15  }
 0x148   : > { %s648_s21 = scalar_lea.sflag [#allocation5], %s647_s4 }
 0x149   : > { %p954_p1 = pnand %p958_p2, %p1581_p6 }
 0x14b   : > { %p955_p4 = pneg %p954_p1 }
 0x14d   : > { %1302 = dma.done.wait (%p955_p4), %s648_s21, 512  }
 0x14e   : > { %1304 = vsyncadd (%p955_p4), %s648_s21, 4294966784  ;;  %s26_s28 = sadd.s32 1, %s1359_s28   ;;  %s1789_s18 = sld [smem:[#allocation27_spill]] }
 0x14f   : > { %p1700_p12 = scmp.ge.s32.totalorder %s26_s28, 58   ;;  %s1790_s6 = sld [smem:[#allocation17_spill]] }
 0x150   : > { %s1791_s20 = sld [smem:[#allocation25_spill]]  ;;  %s1798_s15 = smov %s1311_s16 }
 0x151   : > { %s1792_s10 = sld [smem:[#allocation18_spill]]  ;;  %s1799_s16 = smov %s1315_s17 }
 0x152   : > { %s1793_s23 = sld [smem:[#allocation26_spill]]  ;;  %s1803_s21 = smov %s1335_s22 }
 0x153   : > { %s1794_s24 = sld [smem:[#allocation21_spill]]  ;;  %25 = sbr.rel (!%p1700_p12) target bundleno = 18 (0x12), region = 126 }
 0x154   : > { %s1795_s25 = sld [smem:[#allocation22_spill]]  ;;  %s1800_s17 = smov %s1789_s18 }
 0x155   : > { %s1796_s26 = sld [smem:[#allocation23_spill]]  ;;  %s1801_s18 = smov %s1323_s19 }
 0x156   : > { %s1797_s27 = sld [smem:[#allocation24_spill]]  ;;  %s1802_s19 = smov %s1790_s6 }
 0x157   : > { %s1804_s22 = smov %s1792_s10 }
 0x158   :  { %654 = vsyncpa [#allocation4], 1 }
 0x159   :  { %656 = vsyncpa [#allocation4 + $0x1], 1 }
 0x15a   :  { %657 = vsyncpa [#allocation7], 1 }
 0x15b   :  { %659 = vsyncpa [#allocation7 + $0x1], 1 }
 0x15c   :  { %660 = vsyncpa [#allocation10], 1 }
 0x15d   :  { %662 = vsyncpa [#allocation10 + $0x1], 1 }
 0x15e   :  { %663 = vsyncpa [#allocation5], 1 }
 0x15f   :  { %665 = vsyncpa [#allocation5 + $0x1], 1 }

</bundles_post_ra>
